<compile_context>
chip_gen: v7x
topology: tpu7x:2x2x1
jax: 0.10.0
libtpu: 0.0.40
codegen_flags: <defaults>
</compile_context>

<pallas_src>
import functools
import re

import jax
import jax.numpy as jnp
from jax.experimental import pallas as pl
from jax.experimental.pallas import tpu as pltpu


def soft_attention_kernel(hidden_ref,  # (TB, S, H) compute dtype
                          mask_ref,    # (TB, S)    f32
                          w1_ref,      # (H, H)     compute dtype (W1 pre-transposed)
                          w2_ref,      # (H, H)     compute dtype (W2 pre-transposed)
                          bias_ref,    # (1, H)     f32 : b1 + b2
                          w3_ref,      # (1, H)     f32
                          out_ref,     # (TB, H)    f32
                          *, gate_dtype):
    TB, S, H = hidden_ref.shape
    hid = hidden_ref[...]                                             # (TB, S, H)
    mask = mask_ref[...]                                              # (TB, S) f32

    # Last valid step per row: sum(mask) - 1; a -1 (all-zero mask row, incl.
    # batch padding) wraps to S-1 exactly like torch negative indexing.
    idx = jnp.sum(mask, axis=1, keepdims=True).astype(jnp.int32) - 1  # (TB, 1)
    idx = jnp.where(idx < 0, idx + S, idx)
    iota_s = jax.lax.broadcasted_iota(jnp.int32, (TB, S), 1)
    onehot = jnp.where(iota_s == idx, 1.0, 0.0).astype(hid.dtype)     # (TB, S)

    # ht gather via one-hot multiply + S-reduce (block already resident in
    # VMEM; exact because every non-selected term is exactly zero).
    ht = jnp.sum(onehot[:, :, None] * hid, axis=1)                    # (TB, H)

    # q1 = linear_one(ht); b1 + b2 folded into a single bias row.
    q1 = jnp.dot(ht, w1_ref[...], preferred_element_type=jnp.float32)
    q1 = q1 + bias_ref[...]                                           # (TB, H) f32

    # q2 = linear_two(hidden): one (TB*S, H) @ (H, H) MXU matmul, f32 acc.
    q2 = jnp.dot(hid.reshape(TB * S, H), w2_ref[...],
                 preferred_element_type=jnp.float32).reshape(TB, S, H)

    # Sigmoid gate: bf16 on v6e/v7x bf16 path (faster EUP), f32 otherwise.
    gate = jax.nn.sigmoid((q2 + q1[:, None, :]).astype(gate_dtype))   # (TB, S, H)

    # linear_three: VPU multiply + lane reduce; keepdims keeps the reduced
    # value lane-broadcast (no extra relayout before the final gating).
    alpha = jnp.sum(gate * w3_ref[...].reshape(1, 1, H),
                    axis=-1, keepdims=True)                           # (TB, S, 1) f32
    wgt = alpha * mask[:, :, None]                                    # (TB, S, 1) f32

    # Masked weighted sum over the sequence; hid upcasts per-vreg (no full f32
    # copy of the block is materialized).
    a = jnp.sum(wgt * hid, axis=1)                                    # (TB, H) f32
    out_ref[...] = a.astype(out_ref.dtype)


def _rup8(x):
    return max(8, ((int(x) + 7) // 8) * 8)


def _rdn8(x):
    return max(8, (int(x) // 8) * 8)


def _chip_generation():
    try:
        kind = jax.devices()[0].device_kind.lower()
    except Exception:
        return 0
    m = re.search(r"(\d+)", kind)
    return int(m.group(1)) if m else 0


def _vmem_capacity_bytes():
    try:
        return int(pltpu.get_tpu_info().vmem_capacity_bytes)
    except Exception:
        # v7x carries 64 MiB of VMEM per TensorCore; older parts carry 128 MiB.
        return (64 << 20) if _chip_generation() >= 7 else (128 << 20)


def _choose_tile_b(B, S, H, cbytes, vmem_cap):
    """Batch tile TB (multiple of 8): bytes-sized hidden block, a VMEM budget
    that includes the kernel's f32 temporaries, and (when the batch allows) a
    TB that divides the 8-aligned batch with an even block count (v7x megacore
    balance; more blocks also amortize pipeline prologue/epilogue)."""
    small_vmem = vmem_cap <= (96 << 20)                  # v7x-class (64 MiB) part
    hid_target = (4 << 20) if small_vmem else (8 << 20)
    budget = (40 << 20) if small_vmem else min(int(0.6 * vmem_cap), 80 << 20)

    b8 = _rup8(B)
    row_bytes = max(S * H * cbytes, 1)

    # Bytes-sized hidden block, but keep TB*S >= 512 rows fed to the MXU.
    tb = _rdn8(hid_target // row_bytes)
    tb = max(tb, _rup8(-(-512 // max(S, 1))))

    # VMEM cap per batch row: double-buffered streams + f32 in-kernel
    # temporaries (q2, gate, per-vreg upcasts) + resident weight blocks.
    per_b = (2 * S * H * cbytes      # hidden block (double buffered)
             + 2 * S * 4             # mask
             + 2 * H * 4             # output
             + 3 * S * H * 4)        # f32 temporaries
    resident = 4 * H * H * cbytes + 8 * _rup8(H) * 4
    tb = min(tb, _rdn8(max(budget - resident, 8 * per_b) // per_b))
    tb = min(tb, b8)

    # Prefer a TB dividing the 8-aligned batch (no extra padding); among those,
    # prefer an even block count unless it costs more than one halving of TB.
    best_div = None
    best_even = None
    for t in range(tb, 7, -8):
        if b8 % t:
            continue
        if best_div is None:
            best_div = t
        if (b8 // t) % 2 == 0:
            best_even = t
            break
    if best_div is None:
        best_div = 8
    if best_even is not None and 2 * best_even >= best_div:
        return best_even
    return best_div


def soft_attention(hidden, mask, w1, b1, w2, b2, w3, *, compute_dtype=jnp.bfloat16):
    """hidden: (B, S, H), mask: (B, S) 0/1.
    w1/w2: (H, H) torch-style (out, in); b1/b2: (H,); w3: (1, H).
    compute_dtype: dtype of the streamed hidden block / resident weights
    (MXU accumulation is f32).  Use jnp.float32 as the accuracy fallback."""
    B, S, H = hidden.shape
    gen = _chip_generation()
    vmem_cap = _vmem_capacity_bytes()
    small_vmem = vmem_cap <= (96 << 20)
    cbytes = jnp.dtype(compute_dtype).itemsize

    tb = _choose_tile_b(B, S, H, cbytes, vmem_cap)
    n_blocks = -(-_rup8(B) // tb)
    b_pad = n_blocks * tb

    # Single cast of hidden to the compute dtype (no-op when already there);
    # the only other touch is a <=7-row batch pad (none when B % 8 == 0).
    hidden_c = hidden if hidden.dtype == jnp.dtype(compute_dtype) \
        else hidden.astype(compute_dtype)
    mask_f32 = mask.astype(jnp.float32)
    if b_pad != B:
        pad = b_pad - B
        hidden_c = jnp.pad(hidden_c, ((0, pad), (0, 0), (0, 0)))
        mask_f32 = jnp.pad(mask_f32, ((0, pad), (0, 0)))

    # Small (H, H) weight prep: pre-transpose so the kernel's dots are plain
    # (.., H) @ (H, H); fold b1 + b2 into one bias row.
    w1t_c = jnp.asarray(w1, jnp.float32).T.astype(compute_dtype)
    w2t_c = jnp.asarray(w2, jnp.float32).T.astype(compute_dtype)
    bias_row = (jnp.asarray(b1, jnp.float32)
                + jnp.asarray(b2, jnp.float32)).reshape(1, H)
    w3_row = jnp.asarray(w3, jnp.float32).reshape(1, H)

    # bf16 sigmoid only on chips with a bf16 EUP (v6e/v7x) and only in the
    # low-precision path; f32 on v5e and in the f32 accuracy-fallback path.
    use_bf16_gate = (jnp.dtype(compute_dtype) == jnp.dtype(jnp.bfloat16)) and gen >= 6
    gate_dtype = jnp.bfloat16 if use_bf16_gate else jnp.float32

    # VMEM limit: actual footprint (incl. f32 temporaries) with slack, capped
    # near 40 MiB on v7x and ~80 MiB on 128-MiB parts.
    per_b = 2 * S * H * cbytes + 2 * S * 4 + 2 * H * 4 + 3 * S * H * 4
    vmem_needed = tb * per_b + 4 * H * H * cbytes + 8 * _rup8(H) * 4
    budget_cap = (40 << 20) if small_vmem else min(int(0.6 * vmem_cap), 80 << 20)
    vmem_limit = min(int(1.25 * vmem_needed), budget_cap)
    vmem_limit = max(vmem_limit, int(1.15 * vmem_needed), 16 << 20)
    vmem_limit = int(min(vmem_limit, vmem_cap))

    kernel = functools.partial(soft_attention_kernel, gate_dtype=gate_dtype)

    grid_spec = pltpu.PrefetchScalarGridSpec(
        num_scalar_prefetch=0,
        grid=(n_blocks,),
        in_specs=[
            pl.BlockSpec((tb, S, H), lambda i: (i, 0, 0)),   # hidden block
            pl.BlockSpec((tb, S), lambda i: (i, 0)),         # mask (S on lanes)
            pl.BlockSpec((H, H), lambda i: (0, 0)),          # W1.T (resident)
            pl.BlockSpec((H, H), lambda i: (0, 0)),          # W2.T (resident)
            pl.BlockSpec((1, H), lambda i: (0, 0)),          # b1 + b2 row
            pl.BlockSpec((1, H), lambda i: (0, 0)),          # W3 row
        ],
        out_specs=pl.BlockSpec((tb, H), lambda i: (i, 0)),   # lane-dense output
    )

    out = pl.pallas_call(
        kernel,
        out_shape=jax.ShapeDtypeStruct((b_pad, H), jnp.float32),
        grid_spec=grid_spec,
        compiler_params=pltpu.CompilerParams(
            dimension_semantics=("parallel",),
            vmem_limit_bytes=vmem_limit),
    )(hidden_c, mask_f32, w1t_c, w2t_c, bias_row, w3_row)

    return out[:B]


def soft_attention_ref(hidden, mask, w1, b1, w2, b2, w3):
    """Pure-JAX reference mirroring the PyTorch forward."""
    B, S, H = hidden.shape
    idx = jnp.sum(mask, axis=1).astype(jnp.int32) - 1
    ht = hidden[jnp.arange(B), idx]                                  # (B, H)
    q1 = (ht @ w1.T + b1)[:, None, :]                                # (B, 1, H)
    q2 = hidden @ w2.T + b2                                          # (B, S, H)
    alpha = jax.nn.sigmoid(q1 + q2) @ w3.T                           # (B, S, 1)
    return jnp.sum(alpha * hidden * mask[..., None].astype(jnp.float32), axis=1)


if __name__ == "__main__":
    B, S, H = 2, 8, 32

    key = jax.random.PRNGKey(0)
    k_hid, k_w1, k_b1, k_w2, k_b2, k_w3 = jax.random.split(key, 6)

    hidden = jax.random.normal(k_hid, (B, S, H), dtype=jnp.float32)
    # valid lengths: batch 0 -> 5 steps, batch 1 -> 8 steps
    lengths = jnp.array([5, 8], dtype=jnp.int32)
    mask = (jnp.arange(S)[None, :] < lengths[:, None]).astype(jnp.int32)  # (B, S)

    # Deterministic torch-like init: U(-1/sqrt(H), 1/sqrt(H)), weight shape (out, in).
    bound = 1.0 / (H ** 0.5)
    w1 = jax.random.uniform(k_w1, (H, H), jnp.float32, -bound, bound)
    b1 = jax.random.uniform(k_b1, (H,), jnp.float32, -bound, bound)
    w2 = jax.random.uniform(k_w2, (H, H), jnp.float32, -bound, bound)
    b2 = jax.random.uniform(k_b2, (H,), jnp.float32, -bound, bound)
    w3 = jax.random.uniform(k_w3, (1, H), jnp.float32, -bound, bound)

    ref = soft_attention_ref(hidden, mask, w1, b1, w2, b2, w3)

    # f32 compute path: accuracy fallback, tight check against the reference.
    out_f32 = jax.block_until_ready(
        soft_attention(hidden, mask, w1, b1, w2, b2, w3,
                       compute_dtype=jnp.float32))
    assert out_f32.shape == (B, H)
    assert jnp.allclose(out_f32, ref, atol=1e-4, rtol=1e-4), "f32 mismatch vs reference"

    # Default bf16 path (fast MXU / single HBM pass over hidden): loosened tolerance.
    out_bf16 = jax.block_until_ready(
        soft_attention(hidden, mask, w1, b1, w2, b2, w3))
    assert out_bf16.shape == (B, H)
    assert jnp.allclose(out_bf16, ref, atol=5e-2, rtol=5e-2), "bf16 mismatch vs reference"

    print("KERNEL_OK")
</pallas_src>

<mosaic_0001>
module attributes {stable_mosaic.version = 11 : i64} {
  func.func @soft_attention_kernel(%arg0: i32, %arg1: memref<8x8x32xf32, #tpu.memory_space<vmem>>, %arg2: memref<8x8xf32, #tpu.memory_space<vmem>>, %arg3: memref<32x32xf32, #tpu.memory_space<vmem>>, %arg4: memref<32x32xf32, #tpu.memory_space<vmem>>, %arg5: memref<1x32xf32, #tpu.memory_space<vmem>>, %arg6: memref<1x32xf32, #tpu.memory_space<vmem>>, %arg7: memref<8x32xf32, #tpu.memory_space<vmem>>) attributes {dimension_semantics = [#tpu.dimension_semantics<parallel>], iteration_bounds = array<i64: 1>, scalar_prefetch = 0 : i64, scratch_operands = 0 : i64, tpu.core_type = #tpu.core_type<tc>, window_params = [{transform_indices = @transform_0, window_bounds = array<i64: 8, 8, 32>}, {transform_indices = @transform_1, window_bounds = array<i64: 8, 8>}, {pipeline_mode = #tpu.pipeline_mode<synchronous>, transform_indices = @transform_2, window_bounds = array<i64: 32, 32>}, {pipeline_mode = #tpu.pipeline_mode<synchronous>, transform_indices = @transform_3, window_bounds = array<i64: 32, 32>}, {pipeline_mode = #tpu.pipeline_mode<synchronous>, transform_indices = @transform_4, window_bounds = array<i64: 1, 32>}, {pipeline_mode = #tpu.pipeline_mode<synchronous>, transform_indices = @transform_5, window_bounds = array<i64: 1, 32>}, {transform_indices = @transform_6, window_bounds = array<i64: 8, 32>}]} {
    %c0 = arith.constant 0 : index
    %c0_0 = arith.constant 0 : index
    %c0_1 = arith.constant 0 : index
    %0 = vector.load %arg1[%c0, %c0_0, %c0_1] : memref<8x8x32xf32, #tpu.memory_space<vmem>>, vector<8x8x32xf32>
    %c0_2 = arith.constant 0 : index
    %c0_3 = arith.constant 0 : index
    %1 = vector.load %arg2[%c0_2, %c0_3] : memref<8x8xf32, #tpu.memory_space<vmem>>, vector<8x8xf32>
    %cst = arith.constant dense<0.000000e+00> : vector<8xf32>
    %2 = vector.multi_reduction <add>, %1, %cst [1] : vector<8x8xf32> to vector<8xf32>
    %3 = vector.shape_cast %2 : vector<8xf32> to vector<8x1xf32>
    %4 = arith.fptosi %3 : vector<8x1xf32> to vector<8x1xi32>
    %c1_i32 = arith.constant 1 : i32
    %5 = vector.broadcast %c1_i32 : i32 to vector<8x1xi32>
    %6 = arith.subi %4, %5 : vector<8x1xi32>
    %c0_i32 = arith.constant 0 : i32
    %7 = vector.broadcast %c0_i32 : i32 to vector<8x1xi32>
    %8 = arith.cmpi slt, %6, %7 : vector<8x1xi32>
    %c8_i32 = arith.constant 8 : i32
    %9 = vector.broadcast %c8_i32 : i32 to vector<8x1xi32>
    %10 = arith.addi %6, %9 : vector<8x1xi32>
    %11 = arith.select %8, %10, %6 : vector<8x1xi1>, vector<8x1xi32>
    %12 = tpu.iota {dimensions = array<i32: 1>} : vector<8x8xi32>
    %13 = vector.broadcast %11 : vector<8x1xi32> to vector<8x8xi32>
    %14 = arith.cmpi eq, %12, %13 : vector<8x8xi32>
    %cst_4 = arith.constant 1.000000e+00 : f32
    %cst_5 = arith.constant 0.000000e+00 : f32
    %15 = vector.broadcast %cst_4 : f32 to vector<8x8xf32>
    %16 = vector.broadcast %cst_5 : f32 to vector<8x8xf32>
    %17 = arith.select %14, %15, %16 : vector<8x8xi1>, vector<8x8xf32>
    %18 = vector.shape_cast %17 : vector<8x8xf32> to vector<8x8x1xf32>
    %19 = vector.broadcast %18 : vector<8x8x1xf32> to vector<8x8x32xf32>
    %20 = arith.mulf %19, %0 : vector<8x8x32xf32>
    %cst_6 = arith.constant dense<0.000000e+00> : vector<8x32xf32>
    %21 = vector.multi_reduction <add>, %20, %cst_6 [1] : vector<8x8x32xf32> to vector<8x32xf32>
    %c0_7 = arith.constant 0 : index
    %c0_8 = arith.constant 0 : index
    %22 = vector.load %arg3[%c0_7, %c0_8] : memref<32x32xf32, #tpu.memory_space<vmem>>, vector<32x32xf32>
    %cst_9 = arith.constant dense<0.000000e+00> : vector<8x32xf32>
    %23 = tpu.matmul %21, %22, %cst_9 {dimension_numbers = #tpu.dot_dimension_numbers<[1], [0], [0], [1], [0, 0, 1, 1], [], []>} : vector<8x32xf32>, vector<32x32xf32>, vector<8x32xf32> -> vector<8x32xf32>
    %c0_10 = arith.constant 0 : index
    %c0_11 = arith.constant 0 : index
    %24 = vector.load %arg5[%c0_10, %c0_11] : memref<1x32xf32, #tpu.memory_space<vmem>>, vector<1x32xf32>
    %25 = vector.broadcast %24 : vector<1x32xf32> to vector<8x32xf32>
    %26 = arith.addf %23, %25 : vector<8x32xf32>
    %27 = vector.shape_cast %0 : vector<8x8x32xf32> to vector<64x32xf32>
    %c0_12 = arith.constant 0 : index
    %c0_13 = arith.constant 0 : index
    %28 = vector.load %arg4[%c0_12, %c0_13] : memref<32x32xf32, #tpu.memory_space<vmem>>, vector<32x32xf32>
    %cst_14 = arith.constant dense<0.000000e+00> : vector<64x32xf32>
    %29 = tpu.matmul %27, %28, %cst_14 {dimension_numbers = #tpu.dot_dimension_numbers<[1], [0], [0], [1], [0, 0, 1, 1], [], []>} : vector<64x32xf32>, vector<32x32xf32>, vector<64x32xf32> -> vector<64x32xf32>
    %30 = vector.shape_cast %29 : vector<64x32xf32> to vector<8x8x32xf32>
    %31 = vector.shape_cast %26 : vector<8x32xf32> to vector<8x1x32xf32>
    %32 = vector.broadcast %31 : vector<8x1x32xf32> to vector<8x8x32xf32>
    %33 = arith.addf %30, %32 : vector<8x8x32xf32>
    %34 = arith.negf %33 : vector<8x8x32xf32>
    %35 = math.exp %34 : vector<8x8x32xf32>
    %cst_15 = arith.constant 1.000000e+00 : f32
    %36 = vector.broadcast %cst_15 : f32 to vector<8x8x32xf32>
    %37 = arith.addf %36, %35 : vector<8x8x32xf32>
    %38 = arith.divf %36, %37 : vector<8x8x32xf32>
    %c0_16 = arith.constant 0 : index
    %c0_17 = arith.constant 0 : index
    %39 = vector.load %arg6[%c0_16, %c0_17] : memref<1x32xf32, #tpu.memory_space<vmem>>, vector<1x32xf32>
    %40 = vector.shape_cast %39 : vector<1x32xf32> to vector<1x1x32xf32>
    %41 = vector.broadcast %40 : vector<1x1x32xf32> to vector<8x8x32xf32>
    %42 = arith.mulf %38, %41 : vector<8x8x32xf32>
    %cst_18 = arith.constant dense<0.000000e+00> : vector<8x8xf32>
    %43 = vector.multi_reduction <add>, %42, %cst_18 [2] : vector<8x8x32xf32> to vector<8x8xf32>
    %44 = vector.shape_cast %43 : vector<8x8xf32> to vector<8x8x1xf32>
    %45 = vector.shape_cast %1 : vector<8x8xf32> to vector<8x8x1xf32>
    %46 = arith.mulf %44, %45 : vector<8x8x1xf32>
    %47 = vector.broadcast %46 : vector<8x8x1xf32> to vector<8x8x32xf32>
    %48 = arith.mulf %47, %0 : vector<8x8x32xf32>
    %cst_19 = arith.constant dense<0.000000e+00> : vector<8x32xf32>
    %49 = vector.multi_reduction <add>, %48, %cst_19 [1] : vector<8x8x32xf32> to vector<8x32xf32>
    %c0_20 = arith.constant 0 : index
    %c0_21 = arith.constant 0 : index
    %50 = vector.load %arg7[%c0_20, %c0_21] : memref<8x32xf32, #tpu.memory_space<vmem>>, vector<8x32xf32>
    tpu.vector_store %arg7[%c0_20, %c0_21], %49 {strides = array<i32>} : memref<8x32xf32, #tpu.memory_space<vmem>>, vector<8x32xf32>,
    return
  }
  func.func @transform_0(%arg0: i32) -> (i32, i32, i32) {
    %c0_i32 = arith.constant 0 : i32
    %c0_i32_0 = arith.constant 0 : i32
    %c0_i32_1 = arith.constant 0 : i32
    return %arg0, %c0_i32, %c0_i32_0 : i32, i32, i32
  }
  func.func @transform_1(%arg0: i32) -> (i32, i32) {
    %c0_i32 = arith.constant 0 : i32
    %c0_i32_0 = arith.constant 0 : i32
    return %arg0, %c0_i32 : i32, i32
  }
  func.func @transform_2(%arg0: i32) -> (i32, i32) {
    %c0_i32 = arith.constant 0 : i32
    %c0_i32_0 = arith.constant 0 : i32
    %c0_i32_1 = arith.constant 0 : i32
    return %c0_i32, %c0_i32_0 : i32, i32
  }
  func.func @transform_3(%arg0: i32) -> (i32, i32) {
    %c0_i32 = arith.constant 0 : i32
    %c0_i32_0 = arith.constant 0 : i32
    %c0_i32_1 = arith.constant 0 : i32
    return %c0_i32, %c0_i32_0 : i32, i32
  }
  func.func @transform_4(%arg0: i32) -> (i32, i32) {
    %c0_i32 = arith.constant 0 : i32
    %c0_i32_0 = arith.constant 0 : i32
    %c0_i32_1 = arith.constant 0 : i32
    return %c0_i32, %c0_i32_0 : i32, i32
  }
  func.func @transform_5(%arg0: i32) -> (i32, i32) {
    %c0_i32 = arith.constant 0 : i32
    %c0_i32_0 = arith.constant 0 : i32
    %c0_i32_1 = arith.constant 0 : i32
    return %c0_i32, %c0_i32_0 : i32, i32
  }
  func.func @transform_6(%arg0: i32) -> (i32, i32) {
    %c0_i32 = arith.constant 0 : i32
    %c0_i32_0 = arith.constant 0 : i32
    return %arg0, %c0_i32 : i32, i32
  }
}

</mosaic_0001>

<bundles_post_ra>
// kernel: tpu_custom_call.1
= control target key start
LH: loop header
LB: loop body
LE: loop exit
PB: predicated region body
PF: predicated region fallthrough
CT: control target
= control target key end

     0   :  { %11 = vsyncpa [#allocation3], 0  ;;  %s1347_s0 = inlined_call_operand.hbm [shape: f32[8,8,32], index: 0, kind: input, shape index: {}]   ;;  %s1348_s1 = inlined_call_operand.hbm [shape: f32[8,8], index: 1, kind: input, shape index: {}]   ;;  %s1349_s2 = inlined_call_operand.hbm [shape: f32[32,32], index: 2, kind: input, shape index: {}]   ;;  %s1350_s3 = inlined_call_operand.hbm [shape: f32[32,32], index: 3, kind: input, shape index: {}]   ;;  %s1351_s4 = inlined_call_operand.vmem [shape: f32[1,32], index: 4, kind: input, shape index: {}]   ;;  %s1352_s5 = inlined_call_operand.vmem [shape: f32[1,32], index: 5, kind: input, shape index: {}]   ;;  %s1353_s6 = inlined_call_operand.hbm [shape: f32[8,32], index: 6, kind: output, shape index: {}]  }
   0x1   :  { %12 = vsyncpa [#allocation6], 0 }
   0x2   :  { %13 = vsyncpa [#allocation9], 0 }
   0x3   :  { %14 = vsyncpa [#allocation4], 0  ;;  %s1054_s21 = smov [#allocation5]   ;;  %s1055_s23 = smov [#allocation2]  }
   0x4   :  { %s33_s22 = sshll.u32 %s1054_s21, 4  ;;  %s20_s24 = sshll.u32 %s1055_s23, 4  ;;  %s34_s22 = int_to_ptr.vmem [resolvable:$true] %s33_s22  ;;  %s1100_s24 = int_to_ptr.vmem [resolvable:$true] %s20_s24 }
   0x5   :  { %s936_s27 = scalar_lea.hbm %s1348_s1, 128 }
   0x6   :  { %p937_p0 = scmp.ne.s32.totalorder %s1348_s1, %s936_s27  ;;  %p940_p1 = scmp.lt.u32.totalorder %s936_s27, %s1348_s1 }
   0x8   :  { %p942_p2 = pnand %p940_p1, %p937_p0 }
   0xa   :  { %945 = shalt.err (!%p942_p2)
}
   0xb   :  { %s946_s8 = scalar_lea.vmem %s34_s22, 128  ;;  %p951_p4 = scmp.lt.s32.totalorder %s34_s22, %s34_s22 }
   0xc   :  { %p947_p3 = scmp.ne.s32.totalorder %s34_s22, %s946_s8  ;;  %p952_p5 = scmp.lt.s32.totalorder %s946_s8, %s946_s8 }
   0xe   :  { %p953_p6 = por %p952_p5, %p951_p4 }
  0x10   :  { %p954_p7 = pnand %p953_p6, %p947_p3 }
  0x12   :  { %957 = shalt.err (!%p954_p7)
}
  0x13   :  { %36 = dma.hbm_to_vmem [thread:$0]  %s1348_s1, 128, %s34_s22, [#allocation6]  }
  0x14   :  { %s958_s13 = scalar_lea.hbm %s1347_s0, 1024 }
  0x15   :  { %p959_p8 = scmp.ne.s32.totalorder %s1347_s0, %s958_s13  ;;  %p962_p9 = scmp.lt.u32.totalorder %s958_s13, %s1347_s0 }
  0x17   :  { %p964_p10 = pnand %p962_p9, %p959_p8 }
  0x19   :  { %967 = shalt.err (!%p964_p10)
}
  0x1a   :  { %s968_s18 = scalar_lea.vmem %s1100_s24, 1024  ;;  %p973_p12 = scmp.lt.s32.totalorder %s1100_s24, %s1100_s24 }
  0x1b   :  { %p969_p11 = scmp.ne.s32.totalorder %s1100_s24, %s968_s18  ;;  %p974_p13 = scmp.lt.s32.totalorder %s968_s18, %s968_s18 }
  0x1d   :  { %p975_p0 = por %p974_p13, %p973_p12 }
  0x1f   :  { %p976_p1 = pnand %p975_p0, %p969_p11 }
  0x21   :  { %979 = shalt.err (!%p976_p1)
}
  0x22   :  { %s1056_s1 = smov 128   ;;  %s1057_s19 = smov 8  }
  0x23   :  { %26 = dma.hbm_to_vmem [thread:$0]  %s1347_s0, 1024, %s1100_s24, [#allocation3], %s1056_s1, %s1056_s1, %s1057_s19  }
  0x24   :  { %s1058_s22 = smov [#allocation7]   ;;  %s1059_s25 = smov [#allocation8]  }
  0x25   :  { %s42_s23 = sshll.u32 %s1058_s22, 4  ;;  %s54_s26 = sshll.u32 %s1059_s25, 4  ;;  %s43_s23 = int_to_ptr.vmem [resolvable:$true] %s42_s23  ;;  %s1134_s26 = int_to_ptr.vmem [resolvable:$true] %s54_s26 }
  0x26   :  { %s980_s29 = scalar_lea.hbm %s1349_s2, 512 }
  0x27   :  { %p981_p2 = scmp.ne.s32.totalorder %s1349_s2, %s980_s29  ;;  %p984_p3 = scmp.lt.u32.totalorder %s980_s29, %s1349_s2 }
  0x29   :  { %p986_p4 = pnand %p984_p3, %p981_p2 }
  0x2b   :  { %989 = shalt.err (!%p986_p4)
}
  0x2c   :  { %s990_s0 = scalar_lea.vmem %s43_s23, 512  ;;  %p995_p6 = scmp.lt.s32.totalorder %s43_s23, %s43_s23 }
  0x2d   :  { %p991_p5 = scmp.ne.s32.totalorder %s43_s23, %s990_s0  ;;  %p996_p7 = scmp.lt.s32.totalorder %s990_s0, %s990_s0 }
  0x2f   :  { %p997_p8 = por %p996_p7, %p995_p6 }
  0x31   :  { %p998_p9 = pnand %p997_p8, %p991_p5 }
  0x33   :  { %1001 = shalt.err (!%p998_p9)
}
  0x34   :  { %48 = dma.hbm_to_vmem [thread:$0]  %s1349_s2, 512, %s43_s23, [#allocation6], %s1056_s1, %s1056_s1, %s1057_s19  }
  0x35   :  { %s1002_s13 = scalar_lea.hbm %s1350_s3, 512 }
  0x36   :  { %p1003_p10 = scmp.ne.s32.totalorder %s1350_s3, %s1002_s13  ;;  %p1006_p11 = scmp.lt.u32.totalorder %s1002_s13, %s1350_s3 }
  0x38   :  { %p1008_p12 = pnand %p1006_p11, %p1003_p10 }
  0x3a   :  { %1011 = shalt.err (!%p1008_p12)
}
  0x3b   :  { %s1012_s18 = scalar_lea.vmem %s1134_s26, 512  ;;  %p1017_p0 = scmp.lt.s32.totalorder %s1134_s26, %s1134_s26 }
  0x3c   :  { %p1013_p13 = scmp.ne.s32.totalorder %s1134_s26, %s1012_s18  ;;  %p1018_p1 = scmp.lt.s32.totalorder %s1012_s18, %s1012_s18 }
  0x3e   :  { %p1019_p2 = por %p1018_p1, %p1017_p0 }
  0x40   :  { %p1020_p3 = pnand %p1019_p2, %p1013_p13 }
  0x42   :  { %1023 = shalt.err (!%p1020_p3)
}
  0x43   :  { %60 = dma.hbm_to_vmem [thread:$0]  %s1350_s3, 512, %s1134_s26, [#allocation9], %s1056_s1, %s1056_s1, %s1057_s19  }
  0x44   :  { %1046 = dma.done.wait [#allocation3], 1024  }
  0x45   :  { %1047 = vsyncadd [#allocation3], 4294966272 }
  0x46   :  { %1048 = dma.done.wait [#allocation6], 640  }
  0x47   :  { %1049 = vsyncadd [#allocation6], 4294966656 }
  0x48   :  { %1050 = dma.done.wait [#allocation9], 512  }
  0x49   :  { %1051 = vsyncadd [#allocation9], 4294966784  ;;  %vm86_vm0 = vcmask 64512   ;;  %v1171_v0 = vld [vmem:[#allocation5] sm:$0xff]  ;;  %v95_v2 = vlaneseq  ;;  %vm163_vm1 = vcmask 261120   ;;  %v1176_v8 = vld [vmem:[#allocation2 + $0x10] sm:$0xff] }
  0x4a   :  { %v87_v1 = vsel %vm86_vm0, %v1171_v0, 0.0  ;;  %864 = vmatprep.mubr.msk.f32.mxu1 %vm163_vm1, %v1176_v8  ;;  %v1060_v14 = vmov 0.0   ;;  %v220_v27 = vld [vmem:[#allocation7] sm:$0xff]  ;;  %v221_v28 = vld [vmem:[#allocation7 + $0x8] sm:$0xff]  ;;  %v1061_v32 = vmov 0.0|0.0   ;;  %v222_v36 = vld [vmem:[#allocation7 + $0x10] sm:$0xff] }
  0x4b   :  { %88 = vadd.xlane.f32.xlu0 %v87_v1  ;;  %v1174_v6 = vshrl.u32 %v95_v2, 7  ;;  %v96_v9 = vand.u32 127, %v95_v2  ;;  %v874_v31 = vpack.c.bf16 %v221_v28, %v220_v27  ;;  %873 = vmatprep.subr.bf16.mxu0 %v1061_v32  ;;  %v325_v33 = vld [vmem:[#allocation8] sm:$0xff]  ;;  %v326_v34 = vld [vmem:[#allocation8 + $0x8] sm:$0xff]  ;;  %v223_v37 = vld [vmem:[#allocation7 + $0x18] sm:$0xff]  ;;  %vm1062_vm4 = vmmov 0  }
  0x4c   :  { %v1201_v35 = vpack.c.bf16 %v326_v34, %v325_v33  ;;  %v877_v39 = vpack.c.bf16 %v223_v37, %v222_v36  ;;  %v327_v40 = vld [vmem:[#allocation8 + $0x10] sm:$0xff]  ;;  %v328_v41 = vld [vmem:[#allocation8 + $0x18] sm:$0xff]  ;;  %850 = vmatprep.mubr.msk.f32.mxu0 %vm1062_vm4, %v1060_v14  ;;  %v1220_v45 = vld [vmem:[#allocation2 + $0x28] sm:$0xff]  ;;  %vm239_vm5 = vcmask 1041409   ;;  %vm241_vm6 = vcmask 1042434  }
  0x4d   :  { %v108_v11 = vsub.s32 1, %v1174_v6  ;;  %v1182_v12 = vsub.s32 0, %v1174_v6  ;;  %v115_v18 = vsub.s32 2, %v1174_v6  ;;  %v122_v20 = vsub.s32 3, %v1174_v6  ;;  %875 = vmatpush3.bf16.msra.mxu0 %v874_v31  ;;  %v1212_v43 = vld [vmem:[#allocation2 + $0x18] sm:$0xff]  ;;  %v1214_v44 = vld [vmem:[#allocation2 + $0x20] sm:$0xff] }
  0x4e   :  { %v129_v22 = vsub.s32 4, %v1174_v6  ;;  %v136_v24 = vsub.s32 5, %v1174_v6  ;;  %v143_v26 = vsub.s32 6, %v1174_v6  ;;  %v150_v30 = vsub.s32 7, %v1174_v6  ;;  %876 = vmatprep.subr.bf16.mxu0 %v1061_v32  ;;  %887 = vmatprep.subr.bf16.mxu1 %v1201_v35  ;;  %v1224_v47 = vld [vmem:[#allocation2 + $0x30] sm:$0xff]  ;;  %v1231_v49 = vld [vmem:[#allocation2 + $0x38] sm:$0xff] }
  0x4f   :  { %889 = vmatpush3.bf16.msra.mxu1 %v1201_v35  ;;  %v1207_v42 = vpack.c.bf16 %v328_v41, %v327_v40  ;;  %v646_v46 = vrot.slane %v1171_v0, %v1182_v12  ;;  %v660_v48 = vrot.slane %v1171_v0, %v115_v18  ;;  %v1235_v50 = vld [vmem:[#allocation2 + $0x8] sm:$0xff]  ;;  %v1237_v53 = vld [vmem:[#allocation2] sm:$0xff]  ;;  %vm243_vm7 = vcmask 1043459  }
  0x50   :  { %vm245_vm8 = vcmask 1044484   ;;  %vm247_vm9 = vcmask 1045509   ;;  %vm249_vm10 = vcmask 1046534   ;;  %vm251_vm11 = vcmask 1047559  }
  0x51   :  { %878 = vmatpush3.bf16.msra.mxu0 %v877_v39  ;;  %888 = vmatprep.subr.bf16.mxu1 %v1207_v42 }
  0x52   :  { %880 = vmatprep.subr.bf16.mxu0 %v1201_v35 }
  0x53   :  { %890 = vmatpush3.bf16.msra.mxu1 %v1207_v42 }
  0x56   :  { %865 = vmatmul.mubr.msk.f32.vlgmr.msra.gmra.mrb[0].mxu1 %vm163_vm1, %v1212_v43 }
  0x57   :  { %867 = vmatprep.mubr.msk.f32.mxu1 %vm163_vm1, %v1214_v44 }
  0x5a   :  { %868 = vmatmul.mubr.msk.f32.gmra.mrb[2].mxu1 %vm163_vm1, %v1220_v45 }
  0x5b   :  { %870 = vmatprep.mubr.msk.f32.mxu1 %vm163_vm1, %v1224_v47 }
  0x5e   :  { %871 = vmatmul.mubr.msk.f32.gmra.mrb[4].mxu1 %vm163_vm1, %v1231_v49 }
  0xd8   :  { %v89_v3 = vpop.xlane.xlu0 %88 }
  0xd9   :  { %v891_v4 = vtrunc.f32 %v89_v3 }
  0xdb   :  { %v892_v5 = vcvt.f32.s32 %v891_v4 }
  0xdd   :  { %v805_v7 = vadd.s32 4294967295, %v892_v5 }
  0xdf   :  { %vm92_vm2 = vcmp.lt.s32.totalorder %v805_v7, 0  ;;  %v93_v10 = vadd.s32 8, %v805_v7 }
  0xe1   :  { %v94_v13 = vsel %vm92_vm2, %v93_v10, %v805_v7 }
  0xe2   :  { %vm97_vm3 = vcmp.eq.s32.totalorder %v96_v9, %v94_v13 }
  0xe3   :  { %v98_v15 = vsel %vm97_vm3, 1.0, %v1060_v14 }
  0xe4   :  { %v109_v16 = vrot.slane %v98_v15, %v108_v11  ;;  %v102_v17 = vrot.slane %v98_v15, %v1182_v12  ;;  %v116_v19 = vrot.slane %v98_v15, %v115_v18  ;;  %v123_v21 = vrot.slane %v98_v15, %v122_v20 }
  0xe5   :  { %v130_v23 = vrot.slane %v98_v15, %v129_v22  ;;  %v137_v25 = vrot.slane %v98_v15, %v136_v24  ;;  %v144_v29 = vrot.slane %v98_v15, %v143_v26  ;;  %v151_v38 = vrot.slane %v98_v15, %v150_v30 }
  0xe6   :  { %111 = vbcast.lane.b32.xlu1 %v109_v16, 256  ;;  %104 = vbcast.lane.b32.xlu0 %v102_v17, 256 }
  0xea   :  { %118 = vbcast.lane.b32.xlu1 %v116_v19, 256 }
  0xee   :  { %125 = vbcast.lane.b32.xlu1 %v123_v21, 256 }
  0xf2   :  { %132 = vbcast.lane.b32.xlu1 %v130_v23, 256 }
  0xf6   :  { %139 = vbcast.lane.b32.xlu1 %v137_v25, 256 }
  0xfa   :  { %146 = vbcast.lane.b32.xlu1 %v144_v29, 256 }
  0xfe   :  { %153 = vbcast.lane.b32.xlu1 %v151_v38, 256 }
 0x102   :  { %648 = vbcast.lane.b32.xlu1 %v646_v46, 256 }
 0x106   :  { %662 = vbcast.lane.b32.xlu1 %v660_v48, 256 }
 0x158   :  { %v112_v51 = vpop.permute.xlu1 %111  ;;  %v105_v52 = vpop.permute.xlu0 %104 }
 0x159   :  { %v156_v54 = vmul.f32 %v112_v51, %v1235_v50  ;;  %v155_v55 = vmul.f32 %v105_v52, %v1237_v53 }
 0x15b   :  { %v171_v58 = vsel %vm163_vm1, %v156_v54, 0.0  ;;  %v164_v59 = vsel %vm163_vm1, %v155_v55, 0.0 }
 0x15c   :  { %v119_v56 = vpop.permute.xlu1 %118  ;;  %v172_v62 = vrot.slane %v171_v58, 4  ;;  %v165_v1 = vrot.slane %v164_v59, 4 }
 0x15d   :  { %v157_v57 = vmul.f32 %v119_v56, %v1176_v8 }
 0x15e   :  { %v173_v7 = vadd.f32 %v172_v62, %v171_v58  ;;  %v166_v10 = vadd.f32 %v165_v1, %v164_v59 }
 0x15f   :  { %v178_v60 = vsel %vm163_vm1, %v157_v57, 0.0 }
 0x160   :  { %v126_v61 = vpop.permute.xlu1 %125  ;;  %v179_v2 = vrot.slane %v178_v60, 4  ;;  %v174_v18 = vrot.slane %v173_v7, 2  ;;  %v167_v21 = vrot.slane %v166_v10, 2 }
 0x161   :  { %v158_v63 = vmul.f32 %v126_v61, %v1212_v43 }
 0x162   :  { %v180_v13 = vadd.f32 %v179_v2, %v178_v60  ;;  %v175_v32 = vadd.f32 %v174_v18, %v173_v7  ;;  %v168_v36 = vadd.f32 %v167_v21, %v166_v10 }
 0x163   :  { %v185_v3 = vsel %vm163_vm1, %v158_v63, 0.0 }
 0x164   :  { %v186_v4 = vrot.slane %v185_v3, 4  ;;  %v133_v5 = vpop.permute.xlu1 %132  ;;  %v181_v25 = vrot.slane %v180_v13, 2  ;;  %v176_v51 = vrot.slane %v175_v32, 1  ;;  %v169_v55 = vrot.slane %v168_v36, 1 }
 0x165   :  { %v159_v9 = vmul.f32 %v133_v5, %v1214_v44 }
 0x166   :  { %v187_v15 = vadd.f32 %v186_v4, %v185_v3  ;;  %v182_v38 = vadd.f32 %v181_v25, %v180_v13  ;;  %v177_v63 = vadd.f32 %v176_v51, %v175_v32  ;;  %v170_v2 = vadd.f32 %v169_v55, %v168_v36 }
 0x167   :  { %v192_v14 = vsel %vm163_vm1, %v159_v9, 0.0  ;;  %v667_v32 = vrot.slane %v1171_v0, %v122_v20 }
 0x168   :  { %v193_v16 = vrot.slane %v192_v14, 4  ;;  %v140_v17 = vpop.permute.xlu1 %139  ;;  %v188_v28 = vrot.slane %v187_v15, 2  ;;  %v183_v58 = vrot.slane %v182_v38, 1 }
 0x169   :  { %v160_v19 = vmul.f32 %v140_v17, %v1220_v45  ;;  %669 = vbcast.lane.b32.xlu1 %v667_v32, 256 }
 0x16a   :  { %v194_v23 = vadd.f32 %v193_v16, %v192_v14  ;;  %v189_v40 = vadd.f32 %v188_v28, %v187_v15  ;;  %v184_v7 = vadd.f32 %v183_v58, %v182_v38  ;;  %v240_v15 = vsel %vm239_vm5, %v177_v63, %v170_v2 }
 0x16b   :  { %v199_v27 = vsel %vm163_vm1, %v160_v19, 0.0 }
 0x16c   :  { %v200_v29 = vrot.slane %v199_v27, 4  ;;  %v147_v31 = vpop.permute.xlu1 %146  ;;  %v195_v33 = vrot.slane %v194_v23, 2  ;;  %v190_v60 = vrot.slane %v189_v40, 1  ;;  %v242_v18 = vsel %vm241_vm6, %v184_v7, %v240_v15 }
 0x16d   :  { %v161_v34 = vmul.f32 %v147_v31, %v1224_v47 }
 0x16e   :  { %v201_v37 = vadd.f32 %v200_v29, %v199_v27  ;;  %v196_v52 = vadd.f32 %v195_v33, %v194_v23  ;;  %v191_v9 = vadd.f32 %v190_v60, %v189_v40  ;;  %v653_v33 = vrot.slane %v1171_v0, %v108_v11 }
 0x16f   :  { %v206_v39 = vsel %vm163_vm1, %v161_v34, 0.0  ;;  %v866_v34 = vpop.f32.mrb[0].mxu1  ;;  %v1063_v40 = vmov 1966171168  }
 0x170   :  { %v202_v41 = vrot.slane %v201_v37, 2  ;;  %v207_v46 = vrot.slane %v206_v39, 4  ;;  %v154_v48 = vpop.permute.xlu1 %153  ;;  %v197_v1 = vrot.slane %v196_v52, 1  ;;  %v244_v21 = vsel %vm243_vm7, %v191_v9, %v242_v18  ;;  %655 = vbcast.lane.b32.xlu0 %v653_v33, 256  ;;  %v429_v36 = vpop.f32.mrb[1].mxu1 }
 0x171   :  { %v162_v54 = vmul.f32 %v154_v48, %v1231_v49 }
 0x172   :  { %v203_v56 = vadd.f32 %v202_v41, %v201_v37  ;;  %v208_v57 = vadd.f32 %v207_v46, %v206_v39  ;;  %v198_v14 = vadd.f32 %v197_v1, %v196_v52  ;;  %v869_v37 = vpop.f32.mrb[2].mxu1  ;;  %v461_v41 = vunpack.c.l.s4 %v1063_v40 }
 0x173   :  { %v213_v59 = vsel %vm163_vm1, %v162_v54, 0.0  ;;  %v439_v20 = vpop.f32.mrb[3].mxu1 }
 0x174   :  { %v209_v61 = vrot.slane %v208_v57, 2  ;;  %v214_v62 = vrot.slane %v213_v59, 4  ;;  %v204_v3 = vrot.slane %v203_v56, 1  ;;  %v246_v25 = vsel %vm245_vm8, %v198_v14, %v244_v21  ;;  %v872_v38 = vpop.f32.mrb[4].mxu1 }
 0x175   :  { %v449_v39 = vpop.f32.mrb[5].mxu1  ;;  %v462_v11 = vunpack.c.0.s8 %v461_v41 }
 0x176   :  { %v210_v4 = vadd.f32 %v209_v61, %v208_v57  ;;  %v215_v5 = vadd.f32 %v214_v62, %v213_v59  ;;  %v205_v16 = vadd.f32 %v204_v3, %v203_v56 }
 0x177   :  { %v465_v46 = vsub.s32 %v462_v11, %v1174_v6 }
 0x178   :  { %v211_v10 = vrot.slane %v210_v4, 1  ;;  %v216_v13 = vrot.slane %v215_v5, 2  ;;  %v248_v28 = vsel %vm247_vm9, %v205_v16, %v246_v25 }
 0x17a   :  { %v217_v17 = vadd.f32 %v216_v13, %v215_v5  ;;  %v212_v19 = vadd.f32 %v211_v10, %v210_v4 }
 0x17c   :  { %v218_v23 = vrot.slane %v217_v17, 1  ;;  %v250_v29 = vsel %vm249_vm10, %v212_v19, %v248_v28 }
 0x17e   :  { %v219_v27 = vadd.f32 %v218_v23, %v217_v17 }
 0x180   :  { %v252_v31 = vsel %vm251_vm11, %v219_v27, %v250_v29 }
 0x181   :  { %851 = vmatmul.mubr.msk.f32.vlgmr.msra.gmra.mrb[0].mxu0 %vm163_vm1, %v252_v31 }
 0x182   :  { %882 = vmatpush3.bf16.msra.mxu0 %v1201_v35  ;;  %861 = vmatprep.mubr.msk.f32.mxu0 %vm163_vm1, %v1237_v53  ;;  %v681_v35 = vrot.slane %v1171_v0, %v136_v24  ;;  %v806_v24 = vld [vmem:[%s1351_s4] ss:$0 sm:$0xff] }
 0x183   :  { %884 = vmatprep.subr.bf16.mxu0 %v1207_v42 }
 0x184   :  { %683 = vbcast.lane.b32.xlu1 %v681_v35, 256 }
 0x186   :  { %886 = vmatpush3.bf16.msra.mxu0 %v1207_v42  ;;  %v674_v42 = vrot.slane %v1171_v0, %v129_v22 }
 0x188   :  { %676 = vbcast.lane.b32.xlu0 %v674_v42, 256 }
 0x189   :  { %862 = vmatmul.mubr.msk.f32.vlgmr.msra.gmra.mrb[2].mxu0 %vm163_vm1, %v1235_v50 }
 0x254   :  { %v321_v48 = vpop.f32.mrb[0].mxu0 }
 0x255   :  { %v322_v51 = vadd.f32 %v806_v24, %v321_v48  ;;  %v852_v52 = vpop.f32.mrb[1].mxu0 }
 0x257   :  { %v459_v54 = vcombine.high %v322_v51, %v322_v51  ;;  %v466_v22 = vrot.slane %v322_v51, %v465_v46 }
 0x259   :  { %v473_v55 = vrot.slane %v459_v54, %v465_v46  ;;  %v474_v56 = vcombine.high %v466_v22, %v466_v22  ;;  %v482_v57 = vrot.slane %v466_v22, %v465_v46 }
 0x25b   :  { %v496_v58 = vrot.slane %v474_v56, %v465_v46  ;;  %v511_v59 = vrot.slane %v482_v57, %v1182_v12  ;;  %v504_v60 = vcombine.high %v482_v57, %v482_v57  ;;  %v475_v61 = vcombine.high %v473_v55, %v473_v55  ;;  %v824_v56 = vld [vmem:[%s1352_s5] ss:$0 sm:$0xff]  ;;  %s1064_s5 = smov [#allocation10]  }
 0x25c   :  { %v863_v62 = vpop.f32.mrb[2].mxu0  ;;  %v489_v63 = vrot.slane %v473_v55, %v465_v46  ;;  %s794_s21 = sshll.u32 %s1064_s5, 4  ;;  %s795_s21 = int_to_ptr.vmem [resolvable:$true] %s794_s21 }
 0x25d   :  { %v515_v1 = vrot.slane %v496_v58, %v1182_v12  ;;  %v506_v2 = vcombine.high %v496_v58, %v496_v58  ;;  %v419_v3 = vpop.f32.mrb[3].mxu0  ;;  %v519_v4 = vrot.slane %v504_v60, %v1182_v12  ;;  %v503_v5 = vrot.slane %v475_v61, %v465_v46  ;;  %s1024_s22 = scalar_lea.vmem %s795_s21, 128  ;;  %p1029_p5 = scmp.lt.s32.totalorder %s795_s21, %s795_s21 }
 0x25e   :  { %v548_v7 = vadd.f32 %v511_v59, %v419_v3  ;;  %v527_v9 = vrot.slane %v489_v63, %v1182_v12  ;;  %v505_v10 = vcombine.high %v489_v63, %v489_v63  ;;  %p1025_p4 = scmp.ne.s32.totalorder %s795_s21, %s1024_s22  ;;  %p1030_p6 = scmp.lt.s32.totalorder %s1024_s22, %s1024_s22 }
 0x25f   :  { %v549_v13 = vadd.f32 %v863_v62, %v515_v1  ;;  %v523_v14 = vrot.slane %v506_v2, %v1182_v12  ;;  %v550_v15 = vadd.f32 %v519_v4, %v429_v36  ;;  %v531_v16 = vrot.slane %v503_v5, %v1182_v12 }
 0x260   :  { %v816_v17 = vmul.f32 -1.442695, %v548_v7  ;;  %v552_v18 = vadd.f32 %v527_v9, %v439_v20  ;;  %v507_v19 = vcombine.high %v503_v5, %v503_v5  ;;  %v535_v21 = vrot.slane %v505_v10, %v1182_v12  ;;  %p1031_p7 = por %p1030_p6, %p1029_p5 }
 0x261   :  { %v817_v23 = vmul.f32 -1.442695, %v549_v13  ;;  %v551_v25 = vadd.f32 %v866_v34, %v523_v14  ;;  %v818_v27 = vmul.f32 -1.442695, %v550_v15  ;;  %v553_v28 = vadd.f32 %v869_v37, %v531_v16 }
 0x262   :  { %904 = vpow2.f32 %v816_v17  ;;  %v539_v29 = vrot.slane %v507_v19, %v1182_v12  ;;  %v554_v31 = vadd.f32 %v535_v21, %v449_v39  ;;  %v820_v35 = vmul.f32 -1.442695, %v552_v18  ;;  %p1032_p8 = pnand %p1031_p7, %p1025_p4 }
 0x263   :  { %906 = vpow2.f32 %v817_v23  ;;  %v819_v32 = vmul.f32 -1.442695, %v551_v25  ;;  %v821_v33 = vmul.f32 -1.442695, %v553_v28  ;;  %v695_v25 = vrot.slane %v1171_v0, %v150_v30  ;;  %v649_v28 = vpop.permute.xlu1 %648 }
 0x264   :  { %908 = vpow2.f32 %v818_v27  ;;  %v555_v42 = vadd.f32 %v872_v38, %v539_v29  ;;  %v822_v36 = vmul.f32 -1.442695, %v554_v31  ;;  %v688_v27 = vrot.slane %v1171_v0, %v143_v26  ;;  %v656_v31 = vpop.permute.xlu0 %655 }
 0x265   :  { %910 = vpow2.f32 %v819_v32 }
 0x266   :  { %912 = vpow2.f32 %v821_v33  ;;  %v823_v20 = vmul.f32 -1.442695, %v555_v42 }
 0x267   :  { %914 = vpow2.f32 %v820_v35  ;;  %v663_v29 = vpop.permute.xlu1 %662 }
 0x268   :  { %916 = vpow2.f32 %v822_v36  ;;  %v677_v33 = vpop.permute.xlu0 %676 }
 0x269   :  { %918 = vpow2.f32 %v823_v20 }
 0x26b   :  { %v670_v32 = vpop.permute.xlu1 %669 }
 0x26c   :  { %v905_v34 = vpop.eup %904 }
 0x26d   :  { %v907_v40 = vpop.eup %906  ;;  %v580_v37 = vadd.f32 1.0, %v905_v34 }
 0x26e   :  { %v909_v41 = vpop.eup %908  ;;  %v581_v11 = vadd.f32 1.0, %v907_v40 }
 0x26f   :  { %v911_v12 = vpop.eup %910  ;;  %920 = vrcp.f32 %v580_v37  ;;  %v582_v39 = vadd.f32 1.0, %v909_v41  ;;  %v684_v35 = vpop.permute.xlu1 %683 }
 0x270   :  { %v913_v24 = vpop.eup %912  ;;  %922 = vrcp.f32 %v581_v11  ;;  %v583_v46 = vadd.f32 1.0, %v911_v12 }
 0x271   :  { %v915_v48 = vpop.eup %914  ;;  %924 = vrcp.f32 %v582_v39  ;;  %v585_v52 = vadd.f32 1.0, %v913_v24 }
 0x272   :  { %v584_v38 = vadd.f32 1.0, %v915_v48  ;;  %v917_v51 = vpop.eup %916  ;;  %926 = vrcp.f32 %v583_v46 }
 0x273   :  { %v919_v54 = vpop.eup %918  ;;  %v586_v22 = vadd.f32 1.0, %v917_v51 }
 0x274   :  { %928 = vrcp.f32 %v584_v38  ;;  %v587_v55 = vadd.f32 1.0, %v919_v54 }
 0x275   :  { %930 = vrcp.f32 %v586_v22 }
 0x276   :  { %932 = vrcp.f32 %v585_v52 }
 0x277   :  { %934 = vrcp.f32 %v587_v55 }
 0x279   :  { %v921_v57 = vpop.eup %920 }
 0x27a   :  { %v923_v58 = vpop.eup %922  ;;  %v611_v59 = vmul.f32 %v921_v57, %v824_v56 }
 0x27b   :  { %v925_v60 = vpop.eup %924  ;;  %v612_v61 = vmul.f32 %v923_v58, %v824_v56 }
 0x27c   :  { %v619_v62 = vsel %vm163_vm1, %v611_v59, 0.0  ;;  %v613_v63 = vmul.f32 %v925_v60, %v824_v56  ;;  %v927_v1 = vpop.eup %926 }
 0x27d   :  { %620 = vadd.xlane.f32.xlu0 %v619_v62  ;;  %v622_v2 = vsel %vm163_vm1, %v612_v61, 0.0  ;;  %v614_v9 = vmul.f32 %v927_v1, %v824_v56 }
 0x27e   :  { %v929_v3 = vpop.eup %928  ;;  %623 = vadd.xlane.f32.xlu1 %v622_v2  ;;  %v625_v7 = vsel %vm163_vm1, %v613_v63, 0.0 }
 0x27f   :  { %v615_v4 = vmul.f32 %v929_v3, %v824_v56  ;;  %v931_v5 = vpop.eup %930  ;;  %v628_v15 = vsel %vm163_vm1, %v614_v9, 0.0 }
 0x280   :  { %v933_v10 = vpop.eup %932  ;;  %v617_v14 = vmul.f32 %v931_v5, %v824_v56 }
 0x281   :  { %626 = vadd.xlane.f32.xlu0 %v625_v7  ;;  %v631_v13 = vsel %vm163_vm1, %v615_v4, 0.0  ;;  %v616_v16 = vmul.f32 %v933_v10, %v824_v56  ;;  %v935_v17 = vpop.eup %934 }
 0x282   :  { %632 = vadd.xlane.f32.xlu1 %v631_v13  ;;  %v637_v18 = vsel %vm163_vm1, %v617_v14, 0.0  ;;  %v618_v21 = vmul.f32 %v935_v17, %v824_v56 }
 0x283   :  { %v634_v19 = vsel %vm163_vm1, %v616_v16, 0.0 }
 0x284   :  { %v640_v23 = vsel %vm163_vm1, %v618_v21, 0.0 }
 0x285   :  { %629 = vadd.xlane.f32.xlu0 %v628_v15 }
 0x286   :  { %638 = vadd.xlane.f32.xlu1 %v637_v18 }
 0x289   :  { %635 = vadd.xlane.f32.xlu0 %v634_v19 }
 0x28d   :  { %641 = vadd.xlane.f32.xlu0 %v640_v23 }
 0x297   :  { %697 = vbcast.lane.b32.xlu1 %v695_v25, 256 }
 0x2a3   :  { %690 = vbcast.lane.b32.xlu0 %v688_v27, 256 }
 0x30a   :  { %v621_v42 = vpop.xlane.xlu0 %620 }
 0x30b   :  { %v699_v36 = vmul.f32 %v649_v28, %v621_v42  ;;  %v624_v20 = vpop.xlane.xlu1 %623 }
 0x30c   :  { %v700_v34 = vmul.f32 %v656_v31, %v624_v20 }
 0x30d   :  { %v707_v40 = vmul.f32 %v699_v36, %v1237_v53 }
 0x30e   :  { %v708_v30 = vmul.f32 %v700_v34, %v1235_v50  ;;  %v627_v37 = vpop.xlane.xlu0 %626 }
 0x30f   :  { %v715_v6 = vsel %vm163_vm1, %v707_v40, 0.0  ;;  %v701_v41 = vmul.f32 %v663_v29, %v627_v37  ;;  %v633_v0 = vpop.xlane.xlu1 %632 }
 0x310   :  { %v722_v26 = vsel %vm163_vm1, %v708_v30, 0.0  ;;  %v703_v11 = vmul.f32 %v677_v33, %v633_v0  ;;  %v716_v12 = vrot.slane %v715_v6, 4 }
 0x311   :  { %v723_v39 = vrot.slane %v722_v26, 4  ;;  %v709_v24 = vmul.f32 %v701_v41, %v1176_v8 }
 0x312   :  { %v711_v46 = vmul.f32 %v703_v11, %v1214_v44  ;;  %v630_v48 = vpop.xlane.xlu0 %629  ;;  %v717_v54 = vadd.f32 %v716_v12, %v715_v6 }
 0x313   :  { %v724_v38 = vadd.f32 %v723_v39, %v722_v26  ;;  %v729_v53 = vsel %vm163_vm1, %v709_v24, 0.0  ;;  %v702_v51 = vmul.f32 %v670_v32, %v630_v48  ;;  %v639_v52 = vpop.xlane.xlu1 %638 }
 0x314   :  { %v730_v50 = vrot.slane %v729_v53, 4  ;;  %v743_v22 = vsel %vm163_vm1, %v711_v46, 0.0  ;;  %v718_v62 = vrot.slane %v717_v54, 2 }
 0x315   :  { %v710_v55 = vmul.f32 %v702_v51, %v1212_v43  ;;  %v725_v58 = vrot.slane %v724_v38, 2  ;;  %v744_v60 = vrot.slane %v743_v22, 4 }
 0x316   :  { %v731_v56 = vadd.f32 %v730_v50, %v729_v53  ;;  %v636_v57 = vpop.xlane.xlu0 %635  ;;  %v719_v13 = vadd.f32 %v718_v62, %v717_v54 }
 0x317   :  { %v736_v59 = vsel %vm163_vm1, %v710_v55, 0.0  ;;  %v704_v8 = vmul.f32 %v684_v35, %v636_v57  ;;  %v698_v61 = vpop.permute.xlu1 %697  ;;  %v726_v4 = vadd.f32 %v725_v58, %v724_v38  ;;  %v745_v43 = vadd.f32 %v744_v60, %v743_v22 }
 0x318   :  { %v737_v44 = vrot.slane %v736_v59, 4  ;;  %v732_v1 = vrot.slane %v731_v56, 2  ;;  %v720_v28 = vrot.slane %v719_v13, 1 }
 0x319   :  { %v712_v63 = vmul.f32 %v704_v8, %v1220_v45  ;;  %v727_v18 = vrot.slane %v726_v4, 1  ;;  %v746_v23 = vrot.slane %v745_v43, 2 }
 0x31a   :  { %v738_v2 = vadd.f32 %v737_v44, %v736_v59  ;;  %v642_v3 = vpop.xlane.xlu0 %641  ;;  %v733_v15 = vadd.f32 %v732_v1, %v731_v56  ;;  %v721_v40 = vadd.f32 %v720_v28, %v719_v13 }
 0x31b   :  { %v750_v5 = vsel %vm163_vm1, %v712_v63, 0.0  ;;  %v706_v7 = vmul.f32 %v698_v61, %v642_v3  ;;  %v728_v33 = vadd.f32 %v727_v18, %v726_v4  ;;  %v747_v36 = vadd.f32 %v746_v23, %v745_v43 }
 0x31c   :  { %v739_v9 = vrot.slane %v738_v2, 2  ;;  %v751_v10 = vrot.slane %v750_v5, 4  ;;  %v734_v31 = vrot.slane %v733_v15, 1 }
 0x31d   :  { %v714_v14 = vmul.f32 %v706_v7, %v1231_v49  ;;  %v779_v6 = vsel %vm239_vm5, %v728_v33, %v721_v40  ;;  %v748_v11 = vrot.slane %v747_v36, 1 }
 0x31e   :  { %v752_v16 = vadd.f32 %v751_v10, %v750_v5  ;;  %v691_v17 = vpop.permute.xlu0 %690  ;;  %v740_v19 = vadd.f32 %v739_v9, %v738_v2  ;;  %v735_v30 = vadd.f32 %v734_v31, %v733_v15 }
 0x31f   :  { %v764_v45 = vsel %vm163_vm1, %v714_v14, 0.0  ;;  %v705_v21 = vmul.f32 %v691_v17, %v639_v52  ;;  %v749_v38 = vadd.f32 %v748_v11, %v747_v36 }
 0x320   :  { %v753_v25 = vrot.slane %v752_v16, 2  ;;  %v765_v27 = vrot.slane %v764_v45, 4  ;;  %v741_v35 = vrot.slane %v740_v19, 1  ;;  %v780_v12 = vsel %vm241_vm6, %v735_v30, %v779_v6 }
 0x321   :  { %v713_v29 = vmul.f32 %v705_v21, %v1224_v47 }
 0x322   :  { %v766_v32 = vadd.f32 %v765_v27, %v764_v45  ;;  %v754_v42 = vadd.f32 %v753_v25, %v752_v16  ;;  %v742_v41 = vadd.f32 %v741_v35, %v740_v19 }
 0x323   :  { %v757_v49 = vsel %vm163_vm1, %v713_v29, 0.0 }
 0x324   :  { %v767_v20 = vrot.slane %v766_v32, 2  ;;  %v758_v34 = vrot.slane %v757_v49, 4  ;;  %v755_v0 = vrot.slane %v754_v42, 1  ;;  %v781_v48 = vsel %vm243_vm7, %v742_v41, %v780_v12 }
 0x325   :  { %v782_v50 = vsel %vm245_vm8, %v749_v38, %v781_v48 }
 0x326   :  { %v759_v37 = vadd.f32 %v758_v34, %v757_v49  ;;  %v768_v26 = vadd.f32 %v767_v20, %v766_v32  ;;  %v756_v24 = vadd.f32 %v755_v0, %v754_v42 }
 0x328   :  { %v760_v47 = vrot.slane %v759_v37, 2  ;;  %v769_v46 = vrot.slane %v768_v26, 1  ;;  %v783_v54 = vsel %vm247_vm9, %v756_v24, %v782_v50 }
 0x32a   :  { %v761_v39 = vadd.f32 %v760_v47, %v759_v37  ;;  %v770_v52 = vadd.f32 %v769_v46, %v768_v26 }
 0x32c   :  { %v762_v53 = vrot.slane %v761_v39, 1 }
 0x32e   :  { %v763_v51 = vadd.f32 %v762_v53, %v761_v39 }
 0x330   :  { %v784_v22 = vsel %vm249_vm10, %v763_v51, %v783_v54 }
 0x331   :  { %v785_v55 = vsel %vm251_vm11, %v770_v52, %v784_v22 }
 0x332   :  { %787 = vst.msk [vmem:[#allocation10] sm:$0xff] %vm163_vm1, %v785_v55 }
 0x333   :  { %1035 = shalt.err (!%p1032_p8)
}
 0x334   :  { %s1036_s26 = scalar_lea.hbm %s1353_s6, 128 }
 0x335   :  { %p1037_p9 = scmp.ne.s32.totalorder %s1353_s6, %s1036_s26  ;;  %p1040_p10 = scmp.lt.u32.totalorder %s1036_s26, %s1353_s6 }
 0x337   :  { %p1042_p11 = pnand %p1040_p10, %p1037_p9 }
 0x339   :  { %1045 = shalt.err (!%p1042_p11)
}
 0x33a   :  { %797 = dma.vmem_to_hbm [thread:$0]  %s795_s21, 128, %s1353_s6, [#allocation4]  }
 0x33b   :  { %1052 = dma.done.wait [#allocation4], 128  }
 0x33c   :  { %1053 = vsyncadd [#allocation4], 4294967168 }
 0x33d   :  { %801 = vsyncpa [#allocation3], 1 }
 0x33e   :  { %802 = vsyncpa [#allocation6], 1 }
 0x33f   :  { %803 = vsyncpa [#allocation9], 1 }
 0x340   :  { %804 = vsyncpa [#allocation4], 1 }

</bundles_post_ra>
